<compile_context>
chip_gen: v5e
topology: v5e:2x2
jax: 0.10.0
libtpu: 0.0.40
codegen_flags: <defaults>
</compile_context>

<pallas_src>
import jax
import jax.numpy as jnp
from jax.experimental import pallas as pl
from jax.experimental.pallas import tpu as pltpu

# ----------------------------- model dims -----------------------------------
NUM_WORDS = 30
EMB_DIM = 10
HIDDEN_DIM = 10
NUM_Y = 5
SEQ_LEN = 8

OUT_LANES = 128          # lane-dense padded output width (one full vreg of lanes)
NEG_PAD = -1.0e30        # bias for padded class lanes; exp underflows to exactly 0.0


# ----------------------------- Pallas kernel --------------------------------
def lstm_tagger_kernel(tok_ref, emb_ref, gw_ref, gb_ref, lw_ref, lb_ref,
                       out_ref, x_scratch):
    """Fused: embedding gather + LSTM-cell step + linear + log-softmax.

    tok_ref : (T,)            int32 token ids (SMEM)
    emb_ref : (NUM_WORDS, E)  f32 embedding table (VMEM)
    gw_ref  : (E, 3H)         fused gate weights, column blocks [i | g | o]
    gb_ref  : (1, 3H)         fused gate biases (b_ih + b_hh), blocks [i | g | o]
    lw_ref  : (H, OUT_LANES)  linear weight, zero-padded beyond NUM_Y
    lb_ref  : (1, OUT_LANES)  linear bias, NEG_PAD beyond NUM_Y
    out_ref : (T, OUT_LANES)  log-softmax; valid in lanes [0, NUM_Y)
    x_scratch: (T, E)         VMEM scratch for gathered embeddings
    """
    T = x_scratch.shape[0]
    H = HIDDEN_DIM

    # --- embedding gather: dynamic row loads from the VMEM table (exact copy) ---
    for t in range(T):                      # T is tiny and static -> unrolled
        idx = tok_ref[t]                    # scalar read from SMEM
        x_scratch[pl.ds(t, 1), :] = emb_ref[pl.ds(idx, 1), :]
    x = x_scratch[...]                      # (T, E)

    # --- single fused gate matmul (forget gate dropped: c_prev == 0) ---
    z = jnp.dot(x, gw_ref[...], preferred_element_type=jnp.float32) + gb_ref[...]
    i_gate = jax.nn.sigmoid(z[:, 0:H])
    g_gate = jnp.tanh(z[:, H:2 * H])
    o_gate = jax.nn.sigmoid(z[:, 2 * H:3 * H])

    c = i_gate * g_gate
    h = o_gate * jnp.tanh(c)                # (T, H)

    # --- linear + log-softmax over the lane-dense (padded) class axis ---
    tag = jnp.dot(h, lw_ref[...], preferred_element_type=jnp.float32) + lb_ref[...]
    m = jnp.max(tag, axis=1, keepdims=True)          # padded lanes are -1e30 -> ignored
    shifted = tag - m
    lse = jnp.log(jnp.sum(jnp.exp(shifted), axis=1, keepdims=True))  # exp(pad) == 0.0
    out_ref[...] = shifted - lse


# ------------------------------ wrappers -------------------------------------
def pack_params(gate_w, gate_b, lin_w, lin_b):
    """Pack PyTorch-layout params into the fused/padded kernel layout (done once)."""
    # gate_w: (4, E, H) in gate order [i, f, g, o]; gate_b: (4, 1, H) = b_ih + b_hh.
    gw_f = jnp.concatenate([gate_w[0], gate_w[2], gate_w[3]], axis=1)   # (E, 3H)
    gb_f = jnp.concatenate([gate_b[0], gate_b[2], gate_b[3]], axis=1)   # (1, 3H)
    lw_p = jnp.zeros((HIDDEN_DIM, OUT_LANES), jnp.float32).at[:, :NUM_Y].set(lin_w)
    lb_p = jnp.full((1, OUT_LANES), NEG_PAD, jnp.float32).at[:, :NUM_Y].set(lin_b)
    return gw_f, gb_f, lw_p, lb_p


@jax.jit
def lstm_tagger_forward(tokens, emb_table, gw_f, gb_f, lw_p, lb_p):
    T = tokens.shape[0]
    smem = pl.BlockSpec(memory_space=pltpu.MemorySpace.SMEM)
    vmem = pl.BlockSpec(memory_space=pltpu.MemorySpace.VMEM)
    padded = pl.pallas_call(
        lstm_tagger_kernel,
        out_shape=jax.ShapeDtypeStruct((T, OUT_LANES), jnp.float32),
        in_specs=[smem, vmem, vmem, vmem, vmem, vmem],
        out_specs=vmem,
        scratch_shapes=[pltpu.VMEM((T, EMB_DIM), jnp.float32)],
    )(tokens.astype(jnp.int32), emb_table, gw_f, gb_f, lw_p, lb_p)
    return padded[:, :NUM_Y]
    # TODO(synk): for batched throughput, add a leading grid axis over sentence blocks
    # with dimension_semantics=("parallel",) so v7x's two TensorCores are both used.


# --------------------------- pure-JAX reference ------------------------------
def reference_forward(tokens, emb_table, gate_w, gate_b, lin_w, lin_b):
    x = jnp.take(emb_table, tokens, axis=0)
    zi = x @ gate_w[0] + gate_b[0]
    zg = x @ gate_w[2] + gate_b[2]
    zo = x @ gate_w[3] + gate_b[3]
    # forget gate omitted: c_prev == 0 for every length-1 sequence
    c = jax.nn.sigmoid(zi) * jnp.tanh(zg)
    h = jax.nn.sigmoid(zo) * jnp.tanh(c)
    tag = h @ lin_w + lin_b
    return jax.nn.log_softmax(tag, axis=1)


# ------------------------------- main ----------------------------------------
if __name__ == "__main__":
    key = jax.random.PRNGKey(0)
    k_tok, k_emb, k_gw, k_bih, k_bhh, k_lw, k_lb = jax.random.split(key, 7)

    # Deterministic synthetic parameters (PyTorch-style uniform init scale).
    bound = 1.0 / jnp.sqrt(jnp.float32(HIDDEN_DIM))
    emb_table = jax.random.normal(k_emb, (NUM_WORDS, EMB_DIM), jnp.float32)
    # PyTorch stores weight_ih_l0 as (4H, E); we store it as (4, E, H), gates [i,f,g,o].
    gate_w = jax.random.uniform(k_gw, (4, EMB_DIM, HIDDEN_DIM), jnp.float32,
                                minval=-bound, maxval=bound)
    b_ih = jax.random.uniform(k_bih, (4, 1, HIDDEN_DIM), jnp.float32,
                              minval=-bound, maxval=bound)
    b_hh = jax.random.uniform(k_bhh, (4, 1, HIDDEN_DIM), jnp.float32,
                              minval=-bound, maxval=bound)
    gate_b = b_ih + b_hh
    lin_w = jax.random.uniform(k_lw, (HIDDEN_DIM, NUM_Y), jnp.float32,
                               minval=-bound, maxval=bound)
    lin_b = jax.random.uniform(k_lb, (1, NUM_Y), jnp.float32,
                               minval=-bound, maxval=bound)

    tokens = jax.random.randint(k_tok, (SEQ_LEN,), 0, NUM_WORDS, jnp.int32)

    gw_f, gb_f, lw_p, lb_p = pack_params(gate_w, gate_b, lin_w, lin_b)

    out = lstm_tagger_forward(tokens, emb_table, gw_f, gb_f, lw_p, lb_p)
    out = jax.block_until_ready(out)

    ref = reference_forward(tokens, emb_table, gate_w, gate_b, lin_w, lin_b)
    assert out.shape == (SEQ_LEN, NUM_Y)
    assert jnp.allclose(out, ref, atol=1e-5, rtol=1e-5)

    print("KERNEL_OK")
</pallas_src>

<mosaic_0001>
module attributes {stable_mosaic.version = 11 : i64} {
  func.func @lstm_tagger_kernel(%arg0: memref<8xi32, #tpu.memory_space<smem>>, %arg1: memref<30x10xf32, #tpu.memory_space<vmem>>, %arg2: memref<10x30xf32, #tpu.memory_space<vmem>>, %arg3: memref<1x30xf32, #tpu.memory_space<vmem>>, %arg4: memref<10x128xf32, #tpu.memory_space<vmem>>, %arg5: memref<1x128xf32, #tpu.memory_space<vmem>>, %arg6: memref<8x128xf32, #tpu.memory_space<vmem>>, %arg7: memref<8x10xf32, #tpu.memory_space<vmem>>) attributes {dimension_semantics = [], scalar_prefetch = 0 : i64, scratch_operands = 1 : i64, tpu.core_type = #tpu.core_type<tc>} {
    %c0 = arith.constant 0 : index
    %0 = memref.load %arg0[%c0] : memref<8xi32, #tpu.memory_space<smem>>
    %1 = arith.index_cast %0 : i32 to index
    %c0_0 = arith.constant 0 : index
    %2 = vector.load %arg1[%1, %c0_0] : memref<30x10xf32, #tpu.memory_space<vmem>>, vector<1x10xf32>
    %c0_1 = arith.constant 0 : index
    %c0_2 = arith.constant 0 : index
    %3 = vector.load %arg7[%c0_1, %c0_2] : memref<8x10xf32, #tpu.memory_space<vmem>>, vector<1x10xf32>
    tpu.vector_store %arg7[%c0_1, %c0_2], %2 {strides = array<i32>} : memref<8x10xf32, #tpu.memory_space<vmem>>, vector<1x10xf32>,
    %c1 = arith.constant 1 : index
    %4 = memref.load %arg0[%c1] : memref<8xi32, #tpu.memory_space<smem>>
    %5 = arith.index_cast %4 : i32 to index
    %c0_3 = arith.constant 0 : index
    %6 = vector.load %arg1[%5, %c0_3] : memref<30x10xf32, #tpu.memory_space<vmem>>, vector<1x10xf32>
    %c1_4 = arith.constant 1 : index
    %c0_5 = arith.constant 0 : index
    %7 = vector.load %arg7[%c1_4, %c0_5] : memref<8x10xf32, #tpu.memory_space<vmem>>, vector<1x10xf32>
    tpu.vector_store %arg7[%c1_4, %c0_5], %6 {strides = array<i32>} : memref<8x10xf32, #tpu.memory_space<vmem>>, vector<1x10xf32>,
    %c2 = arith.constant 2 : index
    %8 = memref.load %arg0[%c2] : memref<8xi32, #tpu.memory_space<smem>>
    %9 = arith.index_cast %8 : i32 to index
    %c0_6 = arith.constant 0 : index
    %10 = vector.load %arg1[%9, %c0_6] : memref<30x10xf32, #tpu.memory_space<vmem>>, vector<1x10xf32>
    %c2_7 = arith.constant 2 : index
    %c0_8 = arith.constant 0 : index
    %11 = vector.load %arg7[%c2_7, %c0_8] : memref<8x10xf32, #tpu.memory_space<vmem>>, vector<1x10xf32>
    tpu.vector_store %arg7[%c2_7, %c0_8], %10 {strides = array<i32>} : memref<8x10xf32, #tpu.memory_space<vmem>>, vector<1x10xf32>,
    %c3 = arith.constant 3 : index
    %12 = memref.load %arg0[%c3] : memref<8xi32, #tpu.memory_space<smem>>
    %13 = arith.index_cast %12 : i32 to index
    %c0_9 = arith.constant 0 : index
    %14 = vector.load %arg1[%13, %c0_9] : memref<30x10xf32, #tpu.memory_space<vmem>>, vector<1x10xf32>
    %c3_10 = arith.constant 3 : index
    %c0_11 = arith.constant 0 : index
    %15 = vector.load %arg7[%c3_10, %c0_11] : memref<8x10xf32, #tpu.memory_space<vmem>>, vector<1x10xf32>
    tpu.vector_store %arg7[%c3_10, %c0_11], %14 {strides = array<i32>} : memref<8x10xf32, #tpu.memory_space<vmem>>, vector<1x10xf32>,
    %c4 = arith.constant 4 : index
    %16 = memref.load %arg0[%c4] : memref<8xi32, #tpu.memory_space<smem>>
    %17 = arith.index_cast %16 : i32 to index
    %c0_12 = arith.constant 0 : index
    %18 = vector.load %arg1[%17, %c0_12] : memref<30x10xf32, #tpu.memory_space<vmem>>, vector<1x10xf32>
    %c4_13 = arith.constant 4 : index
    %c0_14 = arith.constant 0 : index
    %19 = vector.load %arg7[%c4_13, %c0_14] : memref<8x10xf32, #tpu.memory_space<vmem>>, vector<1x10xf32>
    tpu.vector_store %arg7[%c4_13, %c0_14], %18 {strides = array<i32>} : memref<8x10xf32, #tpu.memory_space<vmem>>, vector<1x10xf32>,
    %c5 = arith.constant 5 : index
    %20 = memref.load %arg0[%c5] : memref<8xi32, #tpu.memory_space<smem>>
    %21 = arith.index_cast %20 : i32 to index
    %c0_15 = arith.constant 0 : index
    %22 = vector.load %arg1[%21, %c0_15] : memref<30x10xf32, #tpu.memory_space<vmem>>, vector<1x10xf32>
    %c5_16 = arith.constant 5 : index
    %c0_17 = arith.constant 0 : index
    %23 = vector.load %arg7[%c5_16, %c0_17] : memref<8x10xf32, #tpu.memory_space<vmem>>, vector<1x10xf32>
    tpu.vector_store %arg7[%c5_16, %c0_17], %22 {strides = array<i32>} : memref<8x10xf32, #tpu.memory_space<vmem>>, vector<1x10xf32>,
    %c6 = arith.constant 6 : index
    %24 = memref.load %arg0[%c6] : memref<8xi32, #tpu.memory_space<smem>>
    %25 = arith.index_cast %24 : i32 to index
    %c0_18 = arith.constant 0 : index
    %26 = vector.load %arg1[%25, %c0_18] : memref<30x10xf32, #tpu.memory_space<vmem>>, vector<1x10xf32>
    %c6_19 = arith.constant 6 : index
    %c0_20 = arith.constant 0 : index
    %27 = vector.load %arg7[%c6_19, %c0_20] : memref<8x10xf32, #tpu.memory_space<vmem>>, vector<1x10xf32>
    tpu.vector_store %arg7[%c6_19, %c0_20], %26 {strides = array<i32>} : memref<8x10xf32, #tpu.memory_space<vmem>>, vector<1x10xf32>,
    %c7 = arith.constant 7 : index
    %28 = memref.load %arg0[%c7] : memref<8xi32, #tpu.memory_space<smem>>
    %29 = arith.index_cast %28 : i32 to index
    %c0_21 = arith.constant 0 : index
    %30 = vector.load %arg1[%29, %c0_21] : memref<30x10xf32, #tpu.memory_space<vmem>>, vector<1x10xf32>
    %c7_22 = arith.constant 7 : index
    %c0_23 = arith.constant 0 : index
    %31 = vector.load %arg7[%c7_22, %c0_23] : memref<8x10xf32, #tpu.memory_space<vmem>>, vector<1x10xf32>
    tpu.vector_store %arg7[%c7_22, %c0_23], %30 {strides = array<i32>} : memref<8x10xf32, #tpu.memory_space<vmem>>, vector<1x10xf32>,
    %c0_24 = arith.constant 0 : index
    %c0_25 = arith.constant 0 : index
    %32 = vector.load %arg7[%c0_24, %c0_25] : memref<8x10xf32, #tpu.memory_space<vmem>>, vector<8x10xf32>
    %c0_26 = arith.constant 0 : index
    %c0_27 = arith.constant 0 : index
    %33 = vector.load %arg2[%c0_26, %c0_27] : memref<10x30xf32, #tpu.memory_space<vmem>>, vector<10x30xf32>
    %cst = arith.constant dense<0.000000e+00> : vector<8x30xf32>
    %34 = tpu.matmul %32, %33, %cst {dimension_numbers = #tpu.dot_dimension_numbers<[1], [0], [0], [1], [0, 0, 1, 1], [], []>} : vector<8x10xf32>, vector<10x30xf32>, vector<8x30xf32> -> vector<8x30xf32>
    %c0_28 = arith.constant 0 : index
    %c0_29 = arith.constant 0 : index
    %35 = vector.load %arg3[%c0_28, %c0_29] : memref<1x30xf32, #tpu.memory_space<vmem>>, vector<1x30xf32>
    %36 = vector.broadcast %35 : vector<1x30xf32> to vector<8x30xf32>
    %37 = arith.addf %34, %36 : vector<8x30xf32>
    %38 = vector.extract_strided_slice %37 {offsets = [0, 0], sizes = [8, 10], strides = [1, 1]} : vector<8x30xf32> to vector<8x10xf32>
    %39 = arith.negf %38 : vector<8x10xf32>
    %40 = math.exp %39 : vector<8x10xf32>
    %cst_30 = arith.constant 1.000000e+00 : f32
    %41 = vector.broadcast %cst_30 : f32 to vector<8x10xf32>
    %42 = arith.addf %41, %40 : vector<8x10xf32>
    %43 = arith.divf %41, %42 : vector<8x10xf32>
    %44 = vector.extract_strided_slice %37 {offsets = [0, 10], sizes = [8, 10], strides = [1, 1]} : vector<8x30xf32> to vector<8x10xf32>
    %45 = math.tanh %44 : vector<8x10xf32>
    %46 = vector.extract_strided_slice %37 {offsets = [0, 20], sizes = [8, 10], strides = [1, 1]} : vector<8x30xf32> to vector<8x10xf32>
    %47 = arith.negf %46 : vector<8x10xf32>
    %48 = math.exp %47 : vector<8x10xf32>
    %cst_31 = arith.constant 1.000000e+00 : f32
    %49 = vector.broadcast %cst_31 : f32 to vector<8x10xf32>
    %50 = arith.addf %49, %48 : vector<8x10xf32>
    %51 = arith.divf %49, %50 : vector<8x10xf32>
    %52 = arith.mulf %43, %45 : vector<8x10xf32>
    %53 = math.tanh %52 : vector<8x10xf32>
    %54 = arith.mulf %51, %53 : vector<8x10xf32>
    %c0_32 = arith.constant 0 : index
    %c0_33 = arith.constant 0 : index
    %55 = vector.load %arg4[%c0_32, %c0_33] : memref<10x128xf32, #tpu.memory_space<vmem>>, vector<10x128xf32>
    %cst_34 = arith.constant dense<0.000000e+00> : vector<8x128xf32>
    %56 = tpu.matmul %54, %55, %cst_34 {dimension_numbers = #tpu.dot_dimension_numbers<[1], [0], [0], [1], [0, 0, 1, 1], [], []>} : vector<8x10xf32>, vector<10x128xf32>, vector<8x128xf32> -> vector<8x128xf32>
    %c0_35 = arith.constant 0 : index
    %c0_36 = arith.constant 0 : index
    %57 = vector.load %arg5[%c0_35, %c0_36] : memref<1x128xf32, #tpu.memory_space<vmem>>, vector<1x128xf32>
    %58 = vector.broadcast %57 : vector<1x128xf32> to vector<8x128xf32>
    %59 = arith.addf %56, %58 : vector<8x128xf32>
    %cst_37 = arith.constant dense<0xFF800000> : vector<8xf32>
    %60 = vector.multi_reduction <maximumf>, %59, %cst_37 [1] : vector<8x128xf32> to vector<8xf32>
    %61 = vector.shape_cast %60 : vector<8xf32> to vector<8x1xf32>
    %62 = vector.broadcast %61 : vector<8x1xf32> to vector<8x128xf32>
    %63 = arith.subf %59, %62 : vector<8x128xf32>
    %64 = math.exp %63 : vector<8x128xf32>
    %cst_38 = arith.constant dense<0.000000e+00> : vector<8xf32>
    %65 = vector.multi_reduction <add>, %64, %cst_38 [1] : vector<8x128xf32> to vector<8xf32>
    %66 = vector.shape_cast %65 : vector<8xf32> to vector<8x1xf32>
    %67 = math.log %66 : vector<8x1xf32>
    %68 = vector.broadcast %67 : vector<8x1xf32> to vector<8x128xf32>
    %69 = arith.subf %63, %68 : vector<8x128xf32>
    %c0_39 = arith.constant 0 : index
    %c0_40 = arith.constant 0 : index
    %70 = vector.load %arg6[%c0_39, %c0_40] : memref<8x128xf32, #tpu.memory_space<vmem>>, vector<8x128xf32>
    tpu.vector_store %arg6[%c0_39, %c0_40], %69 {strides = array<i32>} : memref<8x128xf32, #tpu.memory_space<vmem>>, vector<8x128xf32>,
    return
  }
}

</mosaic_0001>

<bundles_post_ra>
// kernel: lstm_tagger_forward.1
= control target key start
LH: loop header
LB: loop body
LE: loop exit
PB: predicated region body
PF: predicated region fallthrough
CT: control target
= control target key end

     0   :  { %11 = vsyncpa [#allocation5], 0  ;;  %s377_s0 = inlined_call_operand.vmem [shape: s32[8], index: 0, kind: input, shape index: {}]   ;;  %s378_s1 = inlined_call_operand.vmem [shape: f32[30,10], index: 1, kind: input, shape index: {}]   ;;  %s379_s2 = inlined_call_operand.vmem [shape: f32[10,30], index: 2, kind: input, shape index: {}]   ;;  %s380_s3 = inlined_call_operand.vmem [shape: f32[1,30], index: 3, kind: input, shape index: {}]   ;;  %s381_s4 = inlined_call_operand.vmem [shape: f32[10,128], index: 4, kind: input, shape index: {}]   ;;  %s382_s5 = inlined_call_operand.vmem [shape: f32[1,128], index: 5, kind: input, shape index: {}]   ;;  %s383_s6 = inlined_call_operand.hbm [shape: f32[8,128], index: 6, kind: output, shape index: {}]  }
   0x1   :  { %12 = vsyncpa [#allocation4], 0  ;;  %s18_s23 = sshll.u32 %s377_s0, 4  ;;  %s277_s24 = smov [#allocation3]   ;;  %s19_s23 = int_to_ptr.vmem [resolvable:$true] %s18_s23 }
   0x2   :  { %21 = dma.vmem_to_smem %s19_s23, 16, %s277_s24, [#allocation5]  }
   0x3   :  { %273 = dma.done.wait [#allocation5], 16  }
   0x4   :  { %274 = vsyncadd [#allocation5], 4294967280 }
   0x5   :  { %36 = sfence }
   0x6   :  { %v72_v0 = vld [vmem:[%s379_s2 + $0x8] sm:$0x3]  ;;  %vm81_vm0 = vcmask 1041408   ;;  %v71_v1 = vld [vmem:[%s379_s2] sm:$0xff]  ;;  %s37_s29 = sld [smem:[#allocation3]]  ;;  %vm40_vm1 = vcmask 73728  }
   0x7   :  { %213 = vmatpush.msk.msra.mxu0 %vm81_vm0, %v72_v0  ;;  %s206_s30 = sld [smem:[#allocation3 + $0x1]]  ;;  %vm77_vm2 = vcmask 80896   ;;  %v223_v11 = vld [vmem:[%s380_s3] ss:$0 sm:$0xff]  ;;  %v137_v31 = vld [vmem:[%s381_s4 + $0x8] sm:$0x3] }
   0x8   :  { %s207_s0 = sld [smem:[#allocation3 + $0x2]]  ;;  %v136_v32 = vld [vmem:[%s381_s4] sm:$0xff]  ;;  %216 = vmatpush.msk.msra.mxu1 %vm81_vm0, %v137_v31  ;;  %s281_s4 = smov [#allocation6]  }
   0x9   :  { %100 = vmatpush.msra.mxu0 %v71_v1  ;;  %s208_s7 = sld [smem:[#allocation3 + $0x3]]  ;;  %v224_v36 = vld [vmem:[%s382_s5] ss:$0 sm:$0xff]  ;;  %s186_s18 = sshll.u32 %s281_s4, 4  ;;  %s187_s18 = int_to_ptr.vmem [resolvable:$true] %s186_s18 }
   0xa   :  { %s209_s8 = sld [smem:[#allocation3 + $0x4]]  ;;  %165 = vmatpush.msra.mxu1 %v136_v32  ;;  %s188_s21 = sshll.u32 %s383_s6, 4  ;;  %s189_s21 = int_to_ptr.hbm [resolvable:$true] %s188_s21 }
   0xb   :  { %s210_s9 = sld [smem:[#allocation3 + $0x5]] }
   0xc   :  { %s38_s12 = scalar_lea.vmem %s378_s1, %s37_s29  ;;  %s211_s13 = sld [smem:[#allocation3 + $0x6]] }
   0xd   :  { %v39_v2 = vld [vmem:[%s38_s12] sm:$0x1]  ;;  %s43_s2 = scalar_lea.vmem %s378_s1, %s206_s30  ;;  %s212_s16 = sld [smem:[#allocation3 + $0x7]] }
   0xe   :  { %41 = vst.msk [vmem:[#allocation2] sm:$0x1] %vm40_vm1, %v39_v2  ;;  %v44_v3 = vld [vmem:[%s43_s2] sm:$0x1]  ;;  %s47_s19 = scalar_lea.vmem %s378_s1, %s207_s0  ;;  %s278_s12 = smov 118  }
   0xf   :  { %45 = vst.msk [vmem:[#allocation2 + $0x1] sm:$0x1] %vm40_vm1, %v44_v3  ;;  %v48_v4 = vld [vmem:[%s47_s19] sm:$0x1]  ;;  %s51_s22 = scalar_lea.vmem %s378_s1, %s208_s7  ;;  %s280_s2 = smov 108  }
  0x10   :  { %49 = vst.msk [vmem:[#allocation2 + $0x2] sm:$0x1] %vm40_vm1, %v48_v4  ;;  %v52_v5 = vld [vmem:[%s51_s22] sm:$0x1]  ;;  %s55_s25 = scalar_lea.vmem %s378_s1, %s209_s8 }
  0x11   :  { %53 = vst.msk [vmem:[#allocation2 + $0x3] sm:$0x1] %vm40_vm1, %v52_v5  ;;  %v56_v6 = vld [vmem:[%s55_s25] sm:$0x1]  ;;  %s59_s28 = scalar_lea.vmem %s378_s1, %s210_s9 }
  0x12   :  { %57 = vst.msk [vmem:[#allocation2 + $0x4] sm:$0x1] %vm40_vm1, %v56_v6  ;;  %v60_v7 = vld [vmem:[%s59_s28] sm:$0x1]  ;;  %s63_s0 = scalar_lea.vmem %s378_s1, %s211_s13 }
  0x13   :  { %61 = vst.msk [vmem:[#allocation2 + $0x5] sm:$0x1] %vm40_vm1, %v60_v7  ;;  %v64_v8 = vld [vmem:[%s63_s0] sm:$0x1]  ;;  %s67_s8 = scalar_lea.vmem %s378_s1, %s212_s16  ;;  %s279_s1 = smov 20  }
  0x14   :  { %65 = vst.msk [vmem:[#allocation2 + $0x6] sm:$0x1] %vm40_vm1, %v64_v8  ;;  %v68_v9 = vld [vmem:[%s67_s8] sm:$0x1] }
  0x15   :  { %69 = vst.msk [vmem:[#allocation2 + $0x7] sm:$0x1] %vm40_vm1, %v68_v9 }
  0x1c   :  { %v70_v10 = vld [vmem:[#allocation2] sm:$0xff] }
  0x1d   :  { %214 = vmatmul.msk.f32.vlgmr.msra.gmra.mxu0 %vm77_vm2, %v70_v10 }
  0x9a   :  { %v102_v12 = vpop.f32.mrf.mxu0 }
  0x9b   :  { %v103_v13 = vadd.f32 %v223_v11, %v102_v12 }
  0x9d   :  { %225 = vtanh.f32 %v103_v13  ;;  %v215_v15 = vmul.f32 -1.442695, %v103_v13 }
  0x9f   :  { %227 = vpow2.f32 %v215_v15 }
  0xa3   :  { %v226_v14 = vpop.eup %225 }
  0xa4   :  { %126 = vrot.lane.b32.xlu0 %v226_v14, %s278_s12 }
  0xa5   :  { %v228_v16 = vpop.eup %227 }
  0xa6   :  { %v108_v17 = vadd.f32 1.0, %v228_v16 }
  0xa8   :  { %229 = vrcp.f32 %v108_v17  ;;  %v120_v23 = vand.u32 2147483648, %v108_v17  ;;  %vm114_vm4 = vweird.f32 %v108_v17  ;;  %v118_v24 = vand.u32 2147483647, %v108_v17 }
  0xaa   :  { %v121_v26 = vor.u32 1.1754944e-38, %v120_v23  ;;  %vm119_vm6 = vcmp.eq.f32.partialorder %v118_v24, 8.507059e+37 }
  0xae   :  { %v230_v18 = vpop.eup %229 }
  0xaf   :  { %v110_v19 = vmul.f32 %v230_v18, %v108_v17  ;;  %vm115_vm3 = vweird.f32 %v230_v18 }
  0xb0   :  { %vm116_vm5 = vmor %vm114_vm4, %vm115_vm3 }
  0xb1   :  { %v111_v20 = vsub.f32 1.0, %v110_v19 }
  0xb3   :  { %v112_v21 = vmul.f32 %v230_v18, %v111_v20 }
  0xb5   :  { %v113_v22 = vadd.f32 %v230_v18, %v112_v21 }
  0xb7   :  { %v117_v25 = vsel %vm116_vm5, %v230_v18, %v113_v22 }
  0xb8   :  { %v122_v28 = vsel %vm119_vm6, %v121_v26, %v117_v25 }
 0x116   :  { %v127_v27 = vpop.permute.xlu0 %126 }
 0x117   :  { %v129_v29 = vmul.f32 %v127_v27, %v122_v28 }
 0x119   :  { %231 = vtanh.f32 %v129_v29 }
 0x11f   :  { %v232_v30 = vpop.eup %231 }
 0x120   :  { %132 = vrot.lane.b32.xlu0 %v232_v30, %s279_s1 }
 0x192   :  { %v133_v33 = vpop.permute.xlu0 %132 }
 0x193   :  { %v135_v34 = vmul.f32 %v133_v33, %v122_v28 }
 0x195   :  { %143 = vrot.lane.b32.xlu1 %v135_v34, %s280_s2 }
 0x207   :  { %v144_v35 = vpop.permute.xlu1 %143 }
 0x208   :  { %217 = vmatmul.msk.f32.vlgmr.msra.gmra.mxu1 %vm77_vm2, %v144_v35 }
 0x285   :  { %v167_v37 = vpop.f32.mrf.mxu1 }
 0x286   :  { %v168_v38 = vadd.f32 %v224_v36, %v167_v37 }
 0x288   :  { %170 = vmax.xlane.f32.xlu1 %v168_v38 }
 0x2fb   :  { %v171_v39 = vpop.xlane.xlu1 %170 }
 0x2fc   :  { %v172_v40 = vsub.f32 %v168_v38, %v171_v39 }
 0x2fe   :  { %v173_v41 = vmul.f32 1.442695, %v172_v40 }
 0x300   :  { %233 = vpow2.f32 %v173_v41 }
 0x306   :  { %v234_v42 = vpop.eup %233 }
 0x307   :  { %175 = vadd.xlane.f32.xlu2 %v234_v42 }
 0x37a   :  { %v176_v43 = vpop.xlane.xlu2 %175 }
 0x37b   :  { %235 = vlog2.f32 %v176_v43 }
 0x381   :  { %v236_v44 = vpop.eup %235 }
 0x382   :  { %v178_v45 = vmul.f32 0.6931472, %v236_v44 }
 0x384   :  { %v179_v46 = vsub.f32 %v172_v40, %v178_v45 }
 0x386   :  { %180 = vst [vmem:[#allocation6] sm:$0xff] %v179_v46 }
 0x387   :  { %191 = dma.vmem_to_hbm [thread:$0]  %s187_s18, 128, %s189_s21, [#allocation4]  }
 0x388   :  { %275 = dma.done.wait [#allocation4], 128  }
 0x389   :  { %276 = vsyncadd [#allocation4], 4294967168 }
 0x38a   :  { %196 = vsyncpa [#allocation4], 1 }
 0x38b   :  { %197 = vsyncpa [#allocation5], 1 }

</bundles_post_ra>
